<compile_context>
chip_gen: v5e
topology: v5e:2x2
jax: 0.10.0
libtpu: 0.0.40
codegen_flags: <defaults>
</compile_context>

<pallas_src>
import jax
import jax.numpy as jnp
import numpy as np
from jax.experimental import pallas as pl
from jax.experimental.pallas import tpu as pltpu


# ----------------------------------------------------------------------------
# Kernels
# ----------------------------------------------------------------------------
def scse_fused_kernel(x_ref, w1t_ref, b1_ref, w2t_ref, b2_ref, wspa_ref, o_ref):
    # x block: (Bt, C, HW)  -- HW on lanes, C on sublanes.
    hw = x_ref.shape[2]
    cdt = x_ref.dtype

    # --- channel gate: lane-reduce mean (f32 accumulation, no f32 block copy)
    #     -> tiny 2-layer MLP in f32 -> sigmoid ---
    mean = jnp.sum(x_ref[...], axis=2, dtype=jnp.float32) * (1.0 / hw)      # (Bt, C)
    h = jnp.maximum(
        jnp.dot(mean, w1t_ref[...], preferred_element_type=jnp.float32)
        + b1_ref[...], 0.0)                                                  # (Bt, hid)
    s = jax.nn.sigmoid(
        jnp.dot(h, w2t_ref[...], preferred_element_type=jnp.float32)
        + b2_ref[...])                                                       # (Bt, C)  f32

    # --- spatial gate: multiply in input dtype, sublane-reduce over C with
    #     f32 accumulation; sigmoid on a single (Bt,1,HW) row ---
    spa = jax.nn.sigmoid(
        jnp.sum(x_ref[...] * wspa_ref[...], axis=1, keepdims=True,
                dtype=jnp.float32))                                          # (Bt, 1, HW)

    # fused combine, all elementwise work in the input dtype:
    #   o = x * (s + spa)  (single full-block expression reading x_ref directly)
    o_ref[...] = (x_ref[...]
                  * (s[:, :, None].astype(cdt) + spa.astype(cdt))
                  ).astype(o_ref.dtype)


def scse_apply_kernel(x_ref, s_ref, wspa_ref, o_ref):
    # x block: (1, C, Thw); s block: (1, C, 1) precomputed channel gate (f32).
    cdt = x_ref.dtype
    spa = jax.nn.sigmoid(
        jnp.sum(x_ref[...] * wspa_ref[...], axis=1, keepdims=True,
                dtype=jnp.float32))                                          # (1, 1, Thw)
    o_ref[...] = (x_ref[...]
                  * (s_ref[...].astype(cdt) + spa.astype(cdt))
                  ).astype(o_ref.dtype)


# ----------------------------------------------------------------------------
# Sizing helpers (generation-aware)
# ----------------------------------------------------------------------------
def _vmem_capacity_bytes():
    try:
        info = pltpu.get_tpu_info()
        cap = getattr(info, "vmem_capacity_bytes", None)
        if cap:
            return int(cap)
    except Exception:
        pass
    return 64 << 20  # conservative (v7x-class) fallback


def _budgets():
    cap = _vmem_capacity_bytes()
    if cap <= (64 << 20):
        # v7x-class: 64 MiB VMEM per TC -> keep headroom for compiler scratch,
        # smaller fused-path threshold, 4 MiB blocks to amortize step overhead.
        return {"vmem_cap": 48 << 20, "block_target": 4 << 20,
                "mono_limit": 5 << 20}
    # v5e / v6e: 128 MiB physical VMEM -> raise scoped limit and push more
    # shapes onto the fused (2 HBM passes) path.
    return {"vmem_cap": 100 << 20, "block_target": 4 << 20,
            "mono_limit": 12 << 20}


def _vmem_limit(block_bytes, vmem_cap):
    # 2x in-bufs + 2x out-bufs + a couple of elementwise temps in the input
    # dtype (no f32 block temporaries anymore) + margin.
    return int(min(vmem_cap, max(32 << 20, 8 * block_bytes + (2 << 20))))


# ----------------------------------------------------------------------------
# Wrappers
# ----------------------------------------------------------------------------
def _scse_fused(x, w1t, b1r, w2t, b2r, wspa3, block_bytes_target, vmem_cap):
    B, C, HW = x.shape
    hidden = w1t.shape[1]
    dtype = x.dtype
    itemsize = jnp.dtype(dtype).itemsize
    per_batch = C * HW * itemsize

    # batches per block: fill ~block_bytes_target, but keep >=2 grid steps
    # (DMA/compute overlap + both v7x TensorCores) and >=4 steps whenever that
    # keeps blocks >= 512 KiB. No divisibility constraint: the grid is cdiv'd
    # and the ragged last block's padded rows (undefined contents, possibly
    # NaN) are dropped on writeback, so results stay correct.
    bt = max(1, min(B, block_bytes_target // max(per_batch, 1)))
    bt = min(bt, max(1, pl.cdiv(B, 2)))
    t4 = max(1, pl.cdiv(B, 4))
    if t4 * per_batch >= (512 << 10):
        bt = min(bt, t4)
    grid = (pl.cdiv(B, bt),)
    block_bytes = bt * per_batch
    vmem_limit = _vmem_limit(block_bytes, vmem_cap)

    return pl.pallas_call(
        scse_fused_kernel,
        out_shape=jax.ShapeDtypeStruct((B, C, HW), dtype),
        grid_spec=pltpu.PrefetchScalarGridSpec(
            num_scalar_prefetch=0,
            grid=grid,
            in_specs=[
                pl.BlockSpec((bt, C, HW), lambda i: (i, 0, 0)),
                pl.BlockSpec((C, hidden), lambda i: (0, 0)),
                pl.BlockSpec((1, hidden), lambda i: (0, 0)),
                pl.BlockSpec((hidden, C), lambda i: (0, 0)),
                pl.BlockSpec((1, C), lambda i: (0, 0)),
                pl.BlockSpec((1, C, 1), lambda i: (0, 0, 0)),
            ],
            out_specs=pl.BlockSpec((bt, C, HW), lambda i: (i, 0, 0)),
        ),
        compiler_params=pltpu.CompilerParams(
            dimension_semantics=("parallel",),
            vmem_limit_bytes=vmem_limit),
    )(x, w1t, b1r, w2t, b2r, wspa3)


def _scse_decoupled(x, w1t, b1r, w2t, b2r, wspa3, block_bytes_target, vmem_cap):
    B, C, HW = x.shape
    dtype = x.dtype
    itemsize = jnp.dtype(dtype).itemsize

    # tiny per-(B,C) channel-gate MLP in plain XLA; dtype= keeps the cast fused
    # into the reduction (no materialized f32 copy of x in HBM for bf16 input).
    mean = jnp.mean(x, axis=2, dtype=jnp.float32)                            # (B, C)
    h = jnp.maximum(mean @ w1t + b1r, 0.0)
    s = jax.nn.sigmoid(h @ w2t + b2r).reshape(B, C, 1)                       # (B, C, 1)

    # lane tile: a positive multiple of 128, or the full HW if smaller.
    # (ragged last tile reads undefined padded lanes; the C-reduce is per-lane
    # so garbage stays in lanes that are dropped on writeback.)
    thw = (block_bytes_target // (C * itemsize)) // 128 * 128
    thw = min(HW, max(128, thw))
    n_hw = pl.cdiv(HW, thw)
    block_bytes = C * thw * itemsize
    vmem_limit = _vmem_limit(block_bytes, vmem_cap)

    return pl.pallas_call(
        scse_apply_kernel,
        out_shape=jax.ShapeDtypeStruct((B, C, HW), dtype),
        grid_spec=pltpu.PrefetchScalarGridSpec(
            num_scalar_prefetch=0,
            grid=(B, n_hw),
            in_specs=[
                pl.BlockSpec((1, C, thw), lambda b, j: (b, 0, j)),
                pl.BlockSpec((1, C, 1), lambda b, j: (b, 0, 0)),
                pl.BlockSpec((1, C, 1), lambda b, j: (0, 0, 0)),
            ],
            out_specs=pl.BlockSpec((1, C, thw), lambda b, j: (b, 0, j)),
        ),
        compiler_params=pltpu.CompilerParams(
            dimension_semantics=("parallel", "parallel"),
            vmem_limit_bytes=vmem_limit),
    )(x, s, wspa3)


def scse_block(x_nchw, w1, b1, w2, b2, w_spa, *,
               block_bytes_target=None,
               monolithic_limit_bytes=None):
    """x_nchw: (B, C, H, W). Weights follow the nn.Module layout:
       w1: (hidden, C), b1: (hidden,), w2: (C, hidden), b2: (C,),
       w_spa: conv weight (1, C, 1, 1). Input dtype is preserved."""
    B, C, H, W = x_nchw.shape
    HW = H * W
    hidden = w1.shape[0]

    budgets = _budgets()
    if block_bytes_target is None:
        block_bytes_target = budgets["block_target"]
    if monolithic_limit_bytes is None:
        monolithic_limit_bytes = budgets["mono_limit"]
    vmem_cap = budgets["vmem_cap"]

    # NCHW -> (B, C, HW): contiguous reshape, no extra HBM pass.
    x = x_nchw.reshape(B, C, HW)

    # MLP weights pre-transposed once (f32, the MLP accumulates in f32);
    # spatial-gate weight in the input dtype so the per-element multiply stays
    # in bf16 on v6e/v7x (the C-reduce still accumulates in f32).
    w1t = jnp.asarray(w1, jnp.float32).T                    # (C, hidden)
    b1r = jnp.asarray(b1, jnp.float32).reshape(1, hidden)
    w2t = jnp.asarray(w2, jnp.float32).T                    # (hidden, C)
    b2r = jnp.asarray(b2, jnp.float32).reshape(1, C)
    wspa3 = jnp.asarray(w_spa, x.dtype).reshape(1, C, 1)

    per_batch = C * HW * jnp.dtype(x.dtype).itemsize
    if per_batch <= monolithic_limit_bytes:
        out = _scse_fused(x, w1t, b1r, w2t, b2r, wspa3,
                          block_bytes_target, vmem_cap)
    else:
        out = _scse_decoupled(x, w1t, b1r, w2t, b2r, wspa3,
                              block_bytes_target, vmem_cap)

    # (B, C, HW) -> NCHW: contiguous reshape, free.
    return out.reshape(B, C, H, W)


# ----------------------------------------------------------------------------
# Pure-JAX reference mirroring the PyTorch forward (for verification)
# ----------------------------------------------------------------------------
def scse_reference(x_nchw, w1, b1, w2, b2, w_spa):
    B, C, H, W = x_nchw.shape
    chn = jnp.mean(x_nchw, axis=(2, 3))                      # (B, C)
    chn = jnp.maximum(chn @ w1.T + b1, 0.0)
    chn = jax.nn.sigmoid(chn @ w2.T + b2).reshape(B, C, 1, 1)
    chn_se = x_nchw * chn
    spa = jnp.einsum("bchw,oc->bohw", x_nchw, w_spa.reshape(1, C))
    spa_se = x_nchw * jax.nn.sigmoid(spa)
    return chn_se + spa_se


if __name__ == "__main__":
    key = jax.random.PRNGKey(0)
    B, C, H, W = 2, 32, 16, 16
    reduction = 4
    hidden = C // reduction

    k = jax.random.split(key, 6)
    x = jax.random.normal(k[0], (B, C, H, W), dtype=jnp.float32)
    w1 = jax.random.normal(k[1], (hidden, C), dtype=jnp.float32) * 0.1
    b1 = jax.random.normal(k[2], (hidden,), dtype=jnp.float32) * 0.1
    w2 = jax.random.normal(k[3], (C, hidden), dtype=jnp.float32) * 0.1
    b2 = jax.random.normal(k[4], (C,), dtype=jnp.float32) * 0.1
    w_spa = jax.random.normal(k[5], (1, C, 1, 1), dtype=jnp.float32) * 0.1

    ref = jax.block_until_ready(scse_reference(x, w1, b1, w2, b2, w_spa))

    # fused single-pass path (default for small feature maps)
    out = jax.block_until_ready(scse_block(x, w1, b1, w2, b2, w_spa))
    np.testing.assert_allclose(np.asarray(out), np.asarray(ref),
                               rtol=1e-5, atol=1e-5)

    # also exercise the HW-tiled decoupled path (used for large feature maps)
    out2 = jax.block_until_ready(
        scse_block(x, w1, b1, w2, b2, w_spa, monolithic_limit_bytes=0))
    np.testing.assert_allclose(np.asarray(out2), np.asarray(ref),
                               rtol=1e-5, atol=1e-5)

    print("KERNEL_OK")
</pallas_src>

<mosaic_0001>
module attributes {stable_mosaic.version = 11 : i64} {
  func.func @scse_fused_kernel(%arg0: i32, %arg1: memref<1x32x256xf32, #tpu.memory_space<vmem>>, %arg2: memref<32x8xf32, #tpu.memory_space<vmem>>, %arg3: memref<1x8xf32, #tpu.memory_space<vmem>>, %arg4: memref<8x32xf32, #tpu.memory_space<vmem>>, %arg5: memref<1x32xf32, #tpu.memory_space<vmem>>, %arg6: memref<1x32x1xf32, #tpu.memory_space<vmem>>, %arg7: memref<1x32x256xf32, #tpu.memory_space<vmem>>) attributes {dimension_semantics = [#tpu.dimension_semantics<parallel>], iteration_bounds = array<i64: 2>, scalar_prefetch = 0 : i64, scratch_operands = 0 : i64, tpu.core_type = #tpu.core_type<tc>, window_params = [{transform_indices = @transform_0, window_bounds = array<i64: 1, 32, 256>}, {pipeline_mode = #tpu.pipeline_mode<synchronous>, transform_indices = @transform_1, window_bounds = array<i64: 32, 8>}, {pipeline_mode = #tpu.pipeline_mode<synchronous>, transform_indices = @transform_2, window_bounds = array<i64: 1, 8>}, {pipeline_mode = #tpu.pipeline_mode<synchronous>, transform_indices = @transform_3, window_bounds = array<i64: 8, 32>}, {pipeline_mode = #tpu.pipeline_mode<synchronous>, transform_indices = @transform_4, window_bounds = array<i64: 1, 32>}, {pipeline_mode = #tpu.pipeline_mode<synchronous>, transform_indices = @transform_5, window_bounds = array<i64: 1, 32, 1>}, {transform_indices = @transform_6, window_bounds = array<i64: 1, 32, 256>}]} {
    %c0 = arith.constant 0 : index
    %c0_0 = arith.constant 0 : index
    %c0_1 = arith.constant 0 : index
    %0 = vector.load %arg1[%c0, %c0_0, %c0_1] : memref<1x32x256xf32, #tpu.memory_space<vmem>>, vector<1x32x256xf32>
    %cst = arith.constant dense<0.000000e+00> : vector<1x32xf32>
    %1 = vector.multi_reduction <add>, %0, %cst [2] : vector<1x32x256xf32> to vector<1x32xf32>
    %cst_2 = arith.constant 3.906250e-03 : f32
    %2 = vector.broadcast %cst_2 : f32 to vector<1x32xf32>
    %3 = arith.mulf %1, %2 : vector<1x32xf32>
    %c0_3 = arith.constant 0 : index
    %c0_4 = arith.constant 0 : index
    %4 = vector.load %arg2[%c0_3, %c0_4] : memref<32x8xf32, #tpu.memory_space<vmem>>, vector<32x8xf32>
    %cst_5 = arith.constant dense<0.000000e+00> : vector<1x8xf32>
    %5 = tpu.matmul %3, %4, %cst_5 {dimension_numbers = #tpu.dot_dimension_numbers<[1], [0], [0], [1], [0, 0, 1, 1], [], []>} : vector<1x32xf32>, vector<32x8xf32>, vector<1x8xf32> -> vector<1x8xf32>
    %c0_6 = arith.constant 0 : index
    %c0_7 = arith.constant 0 : index
    %6 = vector.load %arg3[%c0_6, %c0_7] : memref<1x8xf32, #tpu.memory_space<vmem>>, vector<1x8xf32>
    %7 = arith.addf %5, %6 : vector<1x8xf32>
    %cst_8 = arith.constant 0.000000e+00 : f32
    %8 = vector.broadcast %cst_8 : f32 to vector<1x8xf32>
    %9 = arith.maximumf %7, %8 : vector<1x8xf32>
    %c0_9 = arith.constant 0 : index
    %c0_10 = arith.constant 0 : index
    %10 = vector.load %arg4[%c0_9, %c0_10] : memref<8x32xf32, #tpu.memory_space<vmem>>, vector<8x32xf32>
    %cst_11 = arith.constant dense<0.000000e+00> : vector<1x32xf32>
    %11 = tpu.matmul %9, %10, %cst_11 {dimension_numbers = #tpu.dot_dimension_numbers<[1], [0], [0], [1], [0, 0, 1, 1], [], []>} : vector<1x8xf32>, vector<8x32xf32>, vector<1x32xf32> -> vector<1x32xf32>
    %c0_12 = arith.constant 0 : index
    %c0_13 = arith.constant 0 : index
    %12 = vector.load %arg5[%c0_12, %c0_13] : memref<1x32xf32, #tpu.memory_space<vmem>>, vector<1x32xf32>
    %13 = arith.addf %11, %12 : vector<1x32xf32>
    %14 = arith.negf %13 : vector<1x32xf32>
    %15 = math.exp %14 : vector<1x32xf32>
    %cst_14 = arith.constant 1.000000e+00 : f32
    %16 = vector.broadcast %cst_14 : f32 to vector<1x32xf32>
    %17 = arith.addf %16, %15 : vector<1x32xf32>
    %18 = arith.divf %16, %17 : vector<1x32xf32>
    %c0_15 = arith.constant 0 : index
    %c0_16 = arith.constant 0 : index
    %c0_17 = arith.constant 0 : index
    %19 = vector.load %arg1[%c0_15, %c0_16, %c0_17] : memref<1x32x256xf32, #tpu.memory_space<vmem>>, vector<1x32x256xf32>
    %c0_18 = arith.constant 0 : index
    %c0_19 = arith.constant 0 : index
    %c0_20 = arith.constant 0 : index
    %20 = vector.load %arg6[%c0_18, %c0_19, %c0_20] : memref<1x32x1xf32, #tpu.memory_space<vmem>>, vector<1x32x1xf32>
    %21 = vector.broadcast %20 : vector<1x32x1xf32> to vector<1x32x256xf32>
    %22 = arith.mulf %19, %21 : vector<1x32x256xf32>
    %cst_21 = arith.constant dense<0.000000e+00> : vector<1x256xf32>
    %23 = vector.multi_reduction <add>, %22, %cst_21 [1] : vector<1x32x256xf32> to vector<1x256xf32>
    %24 = vector.shape_cast %23 : vector<1x256xf32> to vector<1x1x256xf32>
    %25 = arith.negf %24 : vector<1x1x256xf32>
    %26 = math.exp %25 : vector<1x1x256xf32>
    %cst_22 = arith.constant 1.000000e+00 : f32
    %27 = vector.broadcast %cst_22 : f32 to vector<1x1x256xf32>
    %28 = arith.addf %27, %26 : vector<1x1x256xf32>
    %29 = arith.divf %27, %28 : vector<1x1x256xf32>
    %c0_23 = arith.constant 0 : index
    %c0_24 = arith.constant 0 : index
    %c0_25 = arith.constant 0 : index
    %30 = vector.load %arg1[%c0_23, %c0_24, %c0_25] : memref<1x32x256xf32, #tpu.memory_space<vmem>>, vector<1x32x256xf32>
    %31 = vector.shape_cast %18 : vector<1x32xf32> to vector<1x32x1xf32>
    %32 = vector.broadcast %31 : vector<1x32x1xf32> to vector<1x32x256xf32>
    %33 = vector.broadcast %29 : vector<1x1x256xf32> to vector<1x32x256xf32>
    %34 = arith.addf %32, %33 : vector<1x32x256xf32>
    %35 = arith.mulf %30, %34 : vector<1x32x256xf32>
    %c0_26 = arith.constant 0 : index
    %c0_27 = arith.constant 0 : index
    %c0_28 = arith.constant 0 : index
    %36 = vector.load %arg7[%c0_26, %c0_27, %c0_28] : memref<1x32x256xf32, #tpu.memory_space<vmem>>, vector<1x32x256xf32>
    tpu.vector_store %arg7[%c0_26, %c0_27, %c0_28], %35 {strides = array<i32>} : memref<1x32x256xf32, #tpu.memory_space<vmem>>, vector<1x32x256xf32>,
    return
  }
  func.func @transform_0(%arg0: i32) -> (i32, i32, i32) {
    %c0_i32 = arith.constant 0 : i32
    %c0_i32_0 = arith.constant 0 : i32
    %c0_i32_1 = arith.constant 0 : i32
    return %arg0, %c0_i32, %c0_i32_0 : i32, i32, i32
  }
  func.func @transform_1(%arg0: i32) -> (i32, i32) {
    %c0_i32 = arith.constant 0 : i32
    %c0_i32_0 = arith.constant 0 : i32
    %c0_i32_1 = arith.constant 0 : i32
    return %c0_i32, %c0_i32_0 : i32, i32
  }
  func.func @transform_2(%arg0: i32) -> (i32, i32) {
    %c0_i32 = arith.constant 0 : i32
    %c0_i32_0 = arith.constant 0 : i32
    %c0_i32_1 = arith.constant 0 : i32
    return %c0_i32, %c0_i32_0 : i32, i32
  }
  func.func @transform_3(%arg0: i32) -> (i32, i32) {
    %c0_i32 = arith.constant 0 : i32
    %c0_i32_0 = arith.constant 0 : i32
    %c0_i32_1 = arith.constant 0 : i32
    return %c0_i32, %c0_i32_0 : i32, i32
  }
  func.func @transform_4(%arg0: i32) -> (i32, i32) {
    %c0_i32 = arith.constant 0 : i32
    %c0_i32_0 = arith.constant 0 : i32
    %c0_i32_1 = arith.constant 0 : i32
    return %c0_i32, %c0_i32_0 : i32, i32
  }
  func.func @transform_5(%arg0: i32) -> (i32, i32, i32) {
    %c0_i32 = arith.constant 0 : i32
    %c0_i32_0 = arith.constant 0 : i32
    %c0_i32_1 = arith.constant 0 : i32
    %c0_i32_2 = arith.constant 0 : i32
    return %c0_i32, %c0_i32_0, %c0_i32_1 : i32, i32, i32
  }
  func.func @transform_6(%arg0: i32) -> (i32, i32, i32) {
    %c0_i32 = arith.constant 0 : i32
    %c0_i32_0 = arith.constant 0 : i32
    %c0_i32_1 = arith.constant 0 : i32
    return %arg0, %c0_i32, %c0_i32_0 : i32, i32, i32
  }
}

</mosaic_0001>

<bundles_post_ra>
// kernel: tpu_custom_call.1
= control target key start
LH: loop header
LB: loop body
LE: loop exit
PB: predicated region body
PF: predicated region fallthrough
CT: control target
= control target key end

     0   :  { %11 = vsyncpa [#allocation3], 0  ;;  %s1049_s0 = inlined_call_operand.hbm [shape: f32[2,32,256], index: 0, kind: input, shape index: {}]   ;;  %s1050_s1 = inlined_call_operand.vmem [shape: f32[32,8], index: 1, kind: input, shape index: {}]   ;;  %s1051_s2 = inlined_call_operand.vmem [shape: f32[1,8], index: 2, kind: input, shape index: {}]   ;;  %s1052_s3 = inlined_call_operand.vmem [shape: f32[8,32], index: 3, kind: input, shape index: {}]   ;;  %s1053_s4 = inlined_call_operand.vmem [shape: f32[1,32], index: 4, kind: input, shape index: {}]   ;;  %s1054_s5 = inlined_call_operand.vmem [shape: f32[1,32,1], index: 5, kind: input, shape index: {}]   ;;  %s1055_s6 = inlined_call_operand.hbm [shape: f32[2,32,256], index: 6, kind: output, shape index: {}]  }
   0x1   :  { %13 = vsyncpa [#allocation3 + $0x1], 0 }
   0x2   :  { %14 = vsyncpa [#allocation4], 0 }
   0x3   :  { %16 = vsyncpa [#allocation4 + $0x1], 0  ;;  %s845_s21 = smov 0   ;;  %s847_s22 = smov 0  }
   0x4   :  { %s849_s23 = smov 0   ;;  %s851_s24 = smov 0  }
   0x5 LB: > { %s866_s25 = sadd.s32 4294967295, %s803_s24   ;;  %s615_s26 = sadd.s32 4294967294, %s803_s24   ;;  %s803_s24 = sphi %s851_s24, %s1065_s24   ;;  %s799_s23 = sphi %s849_s23, %s1064_s23   ;;  %s795_s22 = sphi %s847_s22, %s1063_s22   ;;  %s791_s21 = sphi %s845_s21, %s1062_s21  }
   0x6   : > { %s870_s27 = sadd.s32 1, %s803_s24   ;;  %s29_s28 = sadd.s32 1, %s799_s23 }
   0x7   : > { %s26_s29 = ssub.s32 %s803_s24, %s870_s27  ;;  %p36_p0 = scmp.ne.s32.totalorder %s799_s23, %s795_s22 }
   0x8   : > { %p27_p1 = scmp.eq.s32.totalorder %s26_s29, 0  ;;  %p37_p2 = scmp.eq.s32.totalorder %s803_s24, 0 }
   0x9   : > { %p42_p3 = scmp.ne.s32.totalorder %s795_s22, %s791_s21  ;;  %p43_p4 = scmp.eq.s32.totalorder %s866_s25, 0 }
   0xa   : > { %s882_s30 = scalar_select %p27_p1, %s799_s23, %s29_s28  }
   0xb   : > { %p884_p5 = por %p37_p2, %p36_p0  ;;  %p888_p6 = por %p43_p4, %p42_p3 }
   0xc   : > { %p171_p7 = scmp.eq.s32.totalorder %s866_s25, 1  ;;  %p177_p8 = scmp.eq.s32.totalorder %s615_s26, 1 }
   0xd   : > { %p648_p10 = scmp.lt.s32.totalorder %s803_s24, 2  ;;  %s212_s11 = sand.u32 1, %s799_s23  }
   0xe   : > { %p895_p11 = por %p171_p7, %p36_p0  ;;  %p899_p12 = por %p177_p8, %p42_p3 }
   0xf   : > { %s634_s12 = sshll.u32 %s803_s24, 6  ;;  %s618_s13 = sshll.u32 %s212_s11, 6 }
  0x10   : > { %s221_s16 = scalar_lea.hbm %s1049_s0, %s634_s12  ;;  %s216_s18 = scalar_lea.vmem [#allocation2], %s618_s13 }
  0x11   : > { %s222_s17 = sshll.u32 %s221_s16, 4  ;;  %s224_s19 = sshll.u32 %s216_s18, 4  ;;  %s223_s17 = int_to_ptr.hbm [resolvable:$true] %s222_s17  ;;  %s225_s19 = int_to_ptr.vmem [resolvable:$true] %s224_s19 }
  0x12   : > { %p910_p13 = pnand %p648_p10, %p884_p5  ;;  %p621_p0 = scmp.ge.s32.totalorder %s803_s24, 1 }
  0x13   : > { %p232_p1 = scmp.lt.s32.totalorder %s803_s24, 3  ;;  %s213_s26 = scalar_lea.sflag [#allocation3], %s212_s11 }
  0x14   : > { %s707_s28 = sshra.s32 %s223_s17, 4  ;;  %p711_p3 = pneg %p910_p13  ;;  %s708_s28 = int_to_ptr.hbm [resolvable:$true] %s707_s28 }
  0x15   : > { %s709_s29 = scalar_lea.hbm %s708_s28, 64  ;;  %s714_s7 = scalar_lea.hbm %s1049_s0, 128 }
  0x16   : > { %p710_p2 = scmp.ne.s32.totalorder %s708_s28, %s709_s29  ;;  %p715_p5 = scmp.lt.s32.totalorder %s708_s28, %s1049_s0 }
  0x17   : > { %p716_p8 = scmp.lt.s32.totalorder %s714_s7, %s709_s29 }
  0x18   : > { %p712_p4 = pnand %p711_p3, %p710_p2 }
  0x19   : > { %p717_p10 = por %p716_p8, %p715_p5 }
  0x1a   : > { %p713_p7 = pneg %p712_p4 }
  0x1c   : > { %p718_p9 = pnand %p717_p10, %p713_p7 }
  0x1e   : > { %721 = shalt.err (!%p718_p9)
}
  0x1f   : > { %s805_s11 = smov 256   ;;  %s806_s16 = smov 16  }
  0x20   : > { %643 = dma.hbm_to_vmem [thread:$0]  (!%p910_p13), %s223_s17, 1024, %s225_s19, %s213_s26, %s805_s11, %s805_s11, %s806_s16  }
  0x21   : > { %p233_p2 = pnand %p621_p0, %p232_p1 }
  0x22   : > { %s931_s18 = sand.u32 (!%p233_p2), 1, %s795_s22  }
  0x23   : > { %236 = sbr.rel (%p233_p2) target bundleno = 611 (0x263), region = 44  ;;  %s622_s28 = sshll.u32 (!%p233_p2), %s931_s18, 6 }
  0x24   : > { %s239_s29 = scalar_lea.sflag (!%p233_p2), [#allocation3], %s931_s18  ;;  %s242_s12 = scalar_lea.vmem (!%p233_p2), [#allocation2], %s622_s28 }
  0x28   : > { %782 = dma.done.wait (%p888_p6), %s239_s29, 1024  }
  0x29   : > { %784 = vsyncadd (%p888_p6), %s239_s29, 4294966272  ;;  %v941_v0 = vld [vmem:[%s242_s12] sm:$0xff]  ;;  %v943_v1 = vld [vmem:[%s242_s12 + $0x8] sm:$0xff]  ;;  %v305_v16 = vlaneseq  ;;  %vm310_vm0 = vcmask 130112   ;;  %vm314_vm1 = vcmask 195712   ;;  %vm318_vm2 = vcmask 261312  }
  0x2a   : > { %v945_v2 = vld [vmem:[%s242_s12 + $0x20] sm:$0xff]  ;;  %v280_v3 = vadd.f32 %v943_v1, %v941_v0  ;;  %v949_v4 = vld [vmem:[%s242_s12 + $0x28] sm:$0xff]  ;;  %v953_v6 = vld [vmem:[%s242_s12 + $0x10] sm:$0xff]  ;;  %vm320_vm3 = vcmask 261120   ;;  %v807_v39 = vmov 0   ;;  %vm346_vm4 = vcmask 64512  }
  0x2b   : > { %v286_v5 = vadd.f32 %v949_v4, %v945_v2  ;;  %v955_v7 = vld [vmem:[%s242_s12 + $0x18] sm:$0xff]  ;;  %v957_v8 = vld [vmem:[%s242_s12 + $0x30] sm:$0xff]  ;;  %v297_v14 = vld [vmem:[%s1050_s1 + $0x8] sm:$0xff]  ;;  %v306_v19 = vand.u32 127, %v305_v16  ;;  %688 = vset.pattern.permute.xlu0 %v807_v39  ;;  %689 = vset.pattern.permute.xlu1 %v807_v39  ;;  %v479_v46 = vshrl.u32 %v305_v16, 7  ;;  %s271_s11 = scalar_lea.vmem [#allocation5], %s622_s28 }
  0x2c   : > { %281 = vadd.xlane.f32.xlu0 %v280_v3  ;;  %v959_v9 = vld [vmem:[%s242_s12 + $0x38] sm:$0xff]  ;;  %v283_v10 = vadd.f32 %v955_v7, %v953_v6  ;;  %v298_v13 = vld [vmem:[%s1050_s1 + $0x10] sm:$0xff]  ;;  %v296_v15 = vld [vmem:[%s1050_s1] sm:$0xff]  ;;  %687 = vset.pattern.permute.xlu2 %v807_v39  ;;  %s635_s28 = sshll.u32 %s866_s25, 6  ;;  %s539_s8 = sshll.u32 %s271_s11, 4  ;;  %s540_s8 = int_to_ptr.vmem [resolvable:$true] %s539_s8 }
  0x2d   : > { %287 = vadd.xlane.f32.xlu1 %v286_v5  ;;  %v289_v11 = vadd.f32 %v959_v9, %v957_v8  ;;  %v299_v12 = vld [vmem:[%s1050_s1 + $0x18] sm:$0xff]  ;;  %v308_v21 = vadd.s32 4294967288, %v306_v19  ;;  %v312_v22 = vadd.s32 4294967280, %v306_v19  ;;  %v316_v25 = vadd.s32 4294967272, %v306_v19  ;;  %v344_v36 = vld [vmem:[%s1052_s3] sm:$0xff]  ;;  %v391_v37 = vld [vmem:[%s1054_s5 + $0x10] sm:$0xff]  ;;  %s538_s12 = scalar_lea.hbm %s1055_s6, %s635_s28 }
  0x2e   : > { %335 = vmatpush.msra.mxu0 %v299_v12  ;;  %365 = vmatpush.msra.mxu1 %v344_v36  ;;  %v392_v38 = vld [vmem:[%s1054_s5 + $0x18] sm:$0xff]  ;;  %v389_v40 = vld [vmem:[%s1054_s5] sm:$0xff]  ;;  %v390_v41 = vld [vmem:[%s1054_s5 + $0x8] sm:$0xff]  ;;  %v498_v5 = vadd.s32 24, %v479_v46  ;;  %s541_s17 = sshll.u32 %s538_s12, 4  ;;  %s527_s19 = scalar_lea.sflag [#allocation4], %s931_s18  ;;  %s542_s17 = int_to_ptr.hbm [resolvable:$true] %s541_s17 }
  0x2f   : > { %395 = vperm.xlu2 %687, %v389_v40   ;;  %v300_v42 = vld [vmem:[%s1051_s2] sm:$0x1]  ;;  %s751_s25 = sshra.s32 %s542_s17, 4  ;;  %s757_s7 = scalar_lea.hbm %s1055_s6, 128  ;;  %s752_s25 = int_to_ptr.hbm [resolvable:$true] %s751_s25 }
  0x30   : > { %336 = vmatpush.msra.mxu0 %v298_v13  ;;  %v345_v47 = vld [vmem:[%s1053_s4] sm:$0x1]  ;;  %s753_s20 = scalar_lea.hbm %s752_s25, 64  ;;  %p758_p0 = scmp.lt.s32.totalorder %s752_s25, %s1055_s6 }
  0x31   : > { %p754_p6 = scmp.ne.s32.totalorder %s752_s25, %s753_s20  ;;  %p759_p1 = scmp.lt.s32.totalorder %s757_s7, %s753_s20 }
  0x32   : > { %337 = vmatpush.msra.mxu0 %v297_v14 }
  0x33   : > { %p755_p9 = pnand %p754_p6, %p895_p11  ;;  %p760_p3 = por %p759_p1, %p758_p0 }
  0x34   : > { %284 = vadd.xlane.f32.xlu0 %v283_v10  ;;  %338 = vmatpush.msra.mxu0 %v296_v15  ;;  %v486_v10 = vadd.s32 8, %v479_v46 }
  0x35   : > { %290 = vadd.xlane.f32.xlu1 %v289_v11  ;;  %p756_p13 = pneg %p755_p9 }
  0x37   : > { %400 = vperm.xlu2 %687, %v390_v41   ;;  %p761_p4 = pnand %p760_p3, %p756_p13 }
  0x3f   : > { %690 = vset.pattern.permute.xlu2 %v479_v46 }
  0x48   : > { %405 = vperm.xlu0 %688, %v391_v37  }
  0x4e   : > { %410 = vperm.xlu1 %689, %v392_v38  }
  0x50   : > { %694 = vset.pattern.permute.xlu0 %v498_v5 }
  0x89   : > { %v396_v3 = vpop.permute.xlu2 %395 }
  0x8a   : > { %v413_v11 = vmul.f32 %v396_v3, %v941_v0  ;;  %v414_v12 = vmul.f32 %v396_v3, %v943_v1 }
  0x91   : > { %v401_v13 = vpop.permute.xlu2 %400 }
  0x92   : > { %v415_v15 = vmul.f32 %v401_v13, %v953_v6  ;;  %v416_v16 = vmul.f32 %v401_v13, %v955_v7 }
  0x9f   : > { %v282_v17 = vpop.xlane.xlu0 %281 }
  0xa0   : > { %v288_v18 = vpop.xlane.xlu1 %287  ;;  %v292_v20 = vmul.f32 0.00390625, %v282_v17 }
  0xa1   : > { %v294_v23 = vmul.f32 0.00390625, %v288_v18 }
  0xa2   : > { %v307_v29 = vperm.slane %v292_v20, %v306_v19  ;;  %v421_v20 = vadd.f32 %v415_v15, %v413_v11 }
  0xa3   : > { %v313_v31 = vperm.slane %v294_v23, %v312_v22 }
  0xa7   : > { %v285_v24 = vpop.xlane.xlu0 %284 }
  0xa8   : > { %v293_v26 = vmul.f32 0.00390625, %v285_v24  ;;  %v291_v27 = vpop.xlane.xlu1 %290 }
  0xa9   : > { %v295_v28 = vmul.f32 0.00390625, %v291_v27 }
  0xaa   : > { %v309_v30 = vperm.slane %v293_v26, %v308_v21  ;;  %v430_v21 = vadd.f32 %v416_v16, %v414_v12 }
  0xab   : > { %v317_v32 = vperm.slane %v295_v28, %v316_v25 }
  0xac   : > { %v311_v33 = vsel %vm310_vm0, %v309_v30, %v307_v29  ;;  %v492_v30 = vadd.s32 16, %v479_v46 }
  0xad   : > { %v315_v34 = vsel %vm314_vm1, %v313_v31, %v311_v33 }
  0xae   : > { %v319_v35 = vsel %vm318_vm2, %v317_v32, %v315_v34 }
  0xaf   : > { %624 = vmatmul.msk.f32.vlgmr.msra.gmra.mxu0 %vm320_vm3, %v319_v35 }
  0xba   : > { %v406_v14 = vpop.permute.xlu0 %405 }
  0xbb   : > { %v417_v17 = vmul.f32 %v406_v14, %v945_v2  ;;  %v418_v18 = vmul.f32 %v406_v14, %v949_v4 }
  0xbd   : > { %v422_v24 = vadd.f32 %v421_v20, %v417_v17  ;;  %v431_v25 = vadd.f32 %v430_v21, %v418_v18 }
  0xc0   : > { %v411_v19 = vpop.permute.xlu1 %410 }
  0xc1   : > { %v419_v22 = vmul.f32 %v411_v19, %v957_v8  ;;  %v420_v23 = vmul.f32 %v411_v19, %v959_v9 }
  0xc3   : > { %v423_v26 = vadd.f32 %v422_v24, %v419_v22  ;;  %v432_v27 = vadd.f32 %v431_v25, %v420_v23 }
  0xc5   : > { %v424_v28 = vrot.slane %v423_v26, 4  ;;  %v433_v29 = vrot.slane %v432_v27, 4 }
  0xc7   : > { %v425_v31 = vadd.f32 %v424_v28, %v423_v26  ;;  %v434_v32 = vadd.f32 %v433_v29, %v432_v27 }
  0xc9   : > { %v426_v33 = vrot.slane %v425_v31, 2  ;;  %v435_v34 = vrot.slane %v434_v32, 2 }
  0xcb   : > { %v427_v35 = vadd.f32 %v426_v33, %v425_v31  ;;  %v436_v36 = vadd.f32 %v435_v34, %v434_v32 }
  0xcd   : > { %v428_v37 = vrot.slane %v427_v35, 1  ;;  %v437_v38 = vrot.slane %v436_v36, 1 }
  0xcf   : > { %v429_v39 = vadd.f32 %v428_v37, %v427_v35  ;;  %v438_v40 = vadd.f32 %v437_v38, %v436_v36 }
  0xd1   : > { %v627_v41 = vmul.f32 -1.442695, %v429_v39 }
 0x12c   : > { %v340_v43 = vpop.f32.mrf.mxu0 }
 0x12d   : > { %v341_v44 = vadd.f32 %v340_v43, %v300_v42  ;;  %v628_v42 = vmul.f32 -1.442695, %v438_v40 }
 0x12f   : > { %v343_v45 = vmax.f32 %v341_v44, 0.0 }
 0x131   : > { %625 = vmatmul.msk.f32.vlgmr.msra.gmra.mxu1 %vm346_vm4, %v343_v45 }
 0x1ae   : > { %v367_v48 = vpop.f32.mrf.mxu1 }
 0x1af   : > { %v368_v49 = vadd.f32 %v367_v48, %v345_v47 }
 0x1b1   : > { %v626_v50 = vmul.f32 -1.442695, %v368_v49 }
 0x1b3   : > { %695 = vpow2.f32 %v626_v50 }
 0x1b9   : > { %v696_v51 = vpop.eup %695 }
 0x1ba   : > { %v373_v52 = vadd.f32 1.0, %v696_v51 }
 0x1bc   : > { %697 = vrcp.f32 %v373_v52  ;;  %v385_v56 = vand.u32 2147483648, %v373_v52  ;;  %v383_v58 = vand.u32 2147483647, %v373_v52  ;;  %vm379_vm6 = vweird.f32 %v373_v52 }
 0x1bd   : > { %699 = vpow2.f32 %v627_v41 }
 0x1be   : > { %v386_v60 = vor.u32 1.1754944e-38, %v385_v56  ;;  %vm384_vm8 = vcmp.eq.f32.partialorder %v383_v58, 8.507059e+37  ;;  %701 = vpow2.f32 %v628_v42 }
 0x1c2   : > { %v698_v53 = vpop.eup %697 }
 0x1c3   : > { %v375_v54 = vmul.f32 %v698_v53, %v373_v52  ;;  %vm380_vm5 = vweird.f32 %v698_v53  ;;  %v700_v43 = vpop.eup %699 }
 0x1c4   : > { %vm381_vm7 = vmor %vm379_vm6, %vm380_vm5  ;;  %v702_v44 = vpop.eup %701  ;;  %v445_v45 = vadd.f32 1.0, %v700_v43 }
 0x1c5   : > { %v376_v55 = vsub.f32 1.0, %v375_v54  ;;  %v446_v46 = vadd.f32 1.0, %v702_v44 }
 0x1c6   : > { %703 = vrcp.f32 %v445_v45  ;;  %vm452_vm9 = vweird.f32 %v445_v45  ;;  %v456_v58 = vand.u32 2147483647, %v445_v45 }
 0x1c7   : > { %v377_v57 = vmul.f32 %v698_v53, %v376_v55  ;;  %705 = vrcp.f32 %v446_v46  ;;  %vm467_vm11 = vweird.f32 %v446_v46  ;;  %v458_v55 = vand.u32 2147483648, %v445_v45 }
 0x1c8   : > { %v473_v56 = vand.u32 2147483648, %v446_v46  ;;  %vm457_vm15 = vcmp.eq.f32.partialorder %v456_v58, 8.507059e+37 }
 0x1c9   : > { %v378_v59 = vadd.f32 %v698_v53, %v377_v57 }
 0x1cb   : > { %v382_v61 = vsel %vm381_vm7, %v698_v53, %v378_v59 }
 0x1cc   : > { %v387_v62 = vsel %vm384_vm8, %v386_v60, %v382_v61  ;;  %v704_v47 = vpop.eup %703  ;;  %v471_v60 = vand.u32 2147483647, %v446_v46  ;;  %v459_v61 = vor.u32 1.1754944e-38, %v458_v55 }
 0x1cd   : > { %v477_v63 = vperm.slane %v387_v62, 0  ;;  %v706_v48 = vpop.eup %705  ;;  %v448_v49 = vmul.f32 %v704_v47, %v445_v45  ;;  %vm453_vm10 = vweird.f32 %v704_v47  ;;  %v474_v62 = vor.u32 1.1754944e-38, %v473_v56 }
 0x1ce   : > { %v463_v50 = vmul.f32 %v706_v48, %v446_v46  ;;  %vm468_vm12 = vweird.f32 %v706_v48  ;;  %vm454_vm13 = vmor %vm452_vm9, %vm453_vm10  ;;  %vm472_vm0 = vcmp.eq.f32.partialorder %v471_v60, 8.507059e+37 }
 0x1cf   : > { %482 = vperm.xlu2 %690, %v477_v63   ;;  %v449_v51 = vsub.f32 1.0, %v448_v49  ;;  %vm469_vm14 = vmor %vm467_vm11, %vm468_vm12 }
 0x1d0   : > { %v464_v52 = vsub.f32 1.0, %v463_v50 }
 0x1d1   : > { %v450_v53 = vmul.f32 %v704_v47, %v449_v51 }
 0x1d2   : > { %v465_v54 = vmul.f32 %v706_v48, %v464_v52 }
 0x1d3   : > { %v451_v57 = vadd.f32 %v704_v47, %v450_v53 }
 0x1d4   : > { %v466_v59 = vadd.f32 %v706_v48, %v465_v54 }
 0x1d6   : > { %v470_v3 = vsel %vm469_vm14, %v706_v48, %v466_v59 }
 0x1d7   : > { %691 = vset.pattern.permute.xlu2 %v486_v10  ;;  %v475_v10 = vsel %vm472_vm0, %v474_v62, %v470_v3 }
 0x1df   : > { %488 = vperm.xlu2 %691, %v477_v63  }
 0x1e7   : > { %692 = vset.pattern.permute.xlu2 %v492_v30 }
 0x1ef   : > { %494 = vperm.xlu2 %692, %v477_v63  }
 0x1f7   : > { %693 = vset.pattern.permute.xlu2 %v498_v5 }
 0x1ff   : > { %500 = vperm.xlu2 %693, %v477_v63   ;;  %v455_v63 = vsel %vm454_vm13, %v704_v47, %v451_v57 }
 0x200   : > { %v460_v5 = vsel %vm457_vm15, %v459_v61, %v455_v63 }
 0x229   : > { %v483_v11 = vpop.permute.xlu2 %482 }
 0x22a   : > { %v502_v12 = vadd.f32 %v483_v11, %v460_v5  ;;  %v503_v13 = vadd.f32 %v483_v11, %v475_v10 }
 0x22c   : > { %v510_v14 = vmul.f32 %v502_v12, %v941_v0  ;;  %v511_v15 = vmul.f32 %v503_v13, %v943_v1 }
 0x22e   : > { %518 = vst [vmem:[%s271_s11] sm:$0xff] %v510_v14 }
 0x22f   : > { %519 = vst [vmem:[%s271_s11 + $0x8] sm:$0xff] %v511_v15 }
 0x239   : > { %v489_v16 = vpop.permute.xlu2 %488 }
 0x23a   : > { %v504_v17 = vadd.f32 %v489_v16, %v460_v5  ;;  %v505_v18 = vadd.f32 %v489_v16, %v475_v10 }
 0x23c   : > { %v512_v19 = vmul.f32 %v504_v17, %v953_v6  ;;  %v513_v20 = vmul.f32 %v505_v18, %v955_v7 }
 0x23e   : > { %520 = vst [vmem:[%s271_s11 + $0x10] sm:$0xff] %v512_v19 }
 0x23f   : > { %521 = vst [vmem:[%s271_s11 + $0x18] sm:$0xff] %v513_v20 }
 0x249   : > { %v495_v21 = vpop.permute.xlu2 %494 }
 0x24a   : > { %v506_v22 = vadd.f32 %v495_v21, %v460_v5  ;;  %v507_v23 = vadd.f32 %v495_v21, %v475_v10 }
 0x24c   : > { %v514_v0 = vmul.f32 %v506_v22, %v945_v2  ;;  %v515_v1 = vmul.f32 %v507_v23, %v949_v4 }
 0x24e   : > { %522 = vst [vmem:[%s271_s11 + $0x20] sm:$0xff] %v514_v0 }
 0x24f   : > { %523 = vst [vmem:[%s271_s11 + $0x28] sm:$0xff] %v515_v1 }
 0x259   : > { %v501_v6 = vpop.permute.xlu2 %500 }
 0x25a   : > { %v508_v7 = vadd.f32 %v501_v6, %v460_v5  ;;  %v509_v24 = vadd.f32 %v501_v6, %v475_v10 }
 0x25c   : > { %v516_v25 = vmul.f32 %v508_v7, %v957_v8  ;;  %v517_v2 = vmul.f32 %v509_v24, %v959_v9 }
 0x25e   : > { %524 = vst [vmem:[%s271_s11 + $0x30] sm:$0xff] %v516_v25 }
 0x25f   : > { %525 = vst [vmem:[%s271_s11 + $0x38] sm:$0xff] %v517_v2 }
 0x260   : > { %764 = shalt.err (!%p761_p4)
}
 0x261   : > { %s808_s18 = smov 256   ;;  %s809_s11 = smov 16  }
 0x262   : > { %638 = dma.vmem_to_hbm [thread:$0]  (%p895_p11), %s540_s8, 1024, %s542_s17, %s527_s19, %s808_s18, %s808_s18, %s809_s11  }
 0x263 PF: > { %s556_s28 = sand.u32 1, %s791_s21   ;;  %p1061_p7 = scmp.ge.s32.totalorder %s803_s24, 2 }
 0x264   : > { %s557_s16 = scalar_lea.sflag [#allocation4], %s556_s28 }
 0x265   : > { %p645_p5 = pnand %p1061_p7, %p899_p12 }
 0x267   : > { %p646_p8 = pneg %p645_p5 }
 0x269   : > { %786 = dma.done.wait (%p646_p8), %s557_s16, 1024  }
 0x26a   : > { %788 = vsyncadd (%p646_p8), %s557_s16, 4294966272  ;;  %p19_p10 = scmp.ge.s32.totalorder %s870_s27, 4   ;;  %s1062_s21 = smov %s795_s22 }
 0x26b   : > { %s1063_s22 = smov %s799_s23  ;;  %s1064_s23 = smov %s882_s30 }
 0x26c   : > { %s1065_s24 = smov %s870_s27  ;;  %21 = sbr.rel (!%p19_p10) target bundleno = 5 (0x5), region = 89 }
 0x271   :  { %563 = vsyncpa [#allocation3], 1 }
 0x272   :  { %565 = vsyncpa [#allocation3 + $0x1], 1 }
 0x273   :  { %566 = vsyncpa [#allocation4], 1 }
 0x274   :  { %568 = vsyncpa [#allocation4 + $0x1], 1 }

</bundles_post_ra>
